<compile_context>
chip_gen: v7x
topology: tpu7x:2x2x1
jax: 0.10.0
libtpu: 0.0.40
codegen_flags: <defaults>
</compile_context>

<pallas_src>
import functools

import jax
import jax.numpy as jnp
from jax import lax
from jax.experimental import pallas as pl
from jax.experimental.pallas import tpu as pltpu

LANE = 128                       # TPU lane width; K and Cout are padded to this
ENCODER_CHANNELS = (8, 16, 32)   # logical out_channels of the synthetic encoder stages
OUTPUT_DIM = ENCODER_CHANNELS[-1]


def _round_up(x, m):
    return (x + m - 1) // m * m


# ---------------------------------------------------------------------------
# Pallas kernel: one tap-packed matmul per conv layer (+bias +ReLU [+ GAP])
# ---------------------------------------------------------------------------
def _packed_conv_kernel(p_ref, w_ref, b_ref, o_ref, *, n_img, fuse_gap):
    """One 3x3 / stride-2 conv layer as a single MXU matmul.

    p_ref : (M, K)  bf16   im2col patches, M = n_img*ho*wo (batch folded into M),
                           K = 9*C_in_real zero-padded once to a multiple of 128.
    w_ref : (K, TN) bf16   tap-packed weights (row index = tap*C_in_real + c_in).
    b_ref : (1, TN) f32
    o_ref : (M, TN) bf16   conv+bias+ReLU output, or (n_img, TN) f32 when fuse_gap.
    """
    acc = jnp.dot(p_ref[...], w_ref[...], preferred_element_type=jnp.float32)
    y = jnp.maximum(acc + b_ref[...], 0.0)          # f32 epilogue (v5e-safe)
    if fuse_gap:
        # AdaptiveAvgPool2d((1,1)) + flatten fused in: per-image mean over the
        # ho*wo spatial rows, expressed as a tiny pooling matmul so the final
        # feature map never round-trips HBM.  Valid because all of M is in this
        # block; at ResNet scale (M grid axis) this must become a cross-M-tile
        # partial-sum accumulation instead.
        m = p_ref.shape[0]
        m_per = m // n_img
        rows = lax.broadcasted_iota(jnp.int32, (n_img, m), 0)
        cols = lax.broadcasted_iota(jnp.int32, (n_img, m), 1)
        lo = rows * m_per
        pool = jnp.where((cols >= lo) & (cols < lo + m_per),
                         1.0 / m_per, 0.0).astype(jnp.float32)
        o_ref[...] = jnp.dot(pool, y, preferred_element_type=jnp.float32)
    else:
        o_ref[...] = y.astype(o_ref.dtype)


def packed_conv(patches, w_packed, b_packed, *, n_img, fuse_gap=False):
    """conv3x3 / stride-2 / pad-1 + bias + ReLU (optionally + global avg pool).

    patches  : (M, K)       bf16   M = n_img*ho*wo, K = round_up(9*C_in_real, 128)
    w_packed : (K, Cout_p)  bf16   Cout_p = round_up(C_out, 128)
    b_packed : (1, Cout_p)  f32
    returns (M, Cout_p) bf16, or (n_img, Cout_p) f32 when fuse_gap.
    """
    m, k = patches.shape
    k_w, cout_p = w_packed.shape
    assert k == k_w and k % LANE == 0 and cout_p % LANE == 0
    assert b_packed.shape == (1, cout_p)
    assert m % n_img == 0

    tn = LANE
    grid = (cout_p // tn,)   # 1 step at these shapes; "parallel" once layers widen

    if fuse_gap:
        out_shape = jax.ShapeDtypeStruct((n_img, cout_p), jnp.float32)
        out_spec = pl.BlockSpec((n_img, tn), lambda j: (0, j))
    else:
        out_shape = jax.ShapeDtypeStruct((m, cout_p), jnp.bfloat16)
        out_spec = pl.BlockSpec((m, tn), lambda j: (0, j))

    kernel = functools.partial(_packed_conv_kernel, n_img=n_img, fuse_gap=fuse_gap)
    return pl.pallas_call(
        kernel,
        out_shape=out_shape,
        grid_spec=pltpu.PrefetchScalarGridSpec(
            num_scalar_prefetch=0,
            grid=grid,
            in_specs=[
                pl.BlockSpec((m, k), lambda j: (0, 0)),    # patches (same block for all j)
                pl.BlockSpec((k, tn), lambda j: (0, j)),   # tap-packed weights
                pl.BlockSpec((1, tn), lambda j: (0, j)),   # bias
            ],
            out_specs=out_spec,
        ),
        compiler_params=pltpu.CompilerParams(
            dimension_semantics=("parallel",),
            vmem_limit_bytes=32 * 1024 * 1024,   # comfortably inside v7x's 64 MiB VMEM
        ),
    )(patches, w_packed, b_packed)


# ---------------------------------------------------------------------------
# XLA glue: tap-packed im2col (tiny at these shapes)
# ---------------------------------------------------------------------------
# TODO(synk): at ResNet scale move this rearrangement in-kernel (strided index
#             maps / manual DMA) so activations do not round-trip HBM per layer.
def _build_patches(x_nhwc):
    """(N, H, W, C_real) -> ((N*ho*wo, round_up(9*C_real, 128)) bf16, ho, wo)."""
    n, h, w, c = x_nhwc.shape
    assert h % 2 == 0 and w % 2 == 0, "synthetic encoder expects even spatial dims"
    ho, wo = h // 2, w // 2
    xp = jnp.pad(x_nhwc, ((0, 0), (1, 1), (1, 1), (0, 0)))
    cols = []
    for di in range(3):
        for dj in range(3):
            s = xp[:, di:di + 2 * ho:2, dj:dj + 2 * wo:2, :]   # (n, ho, wo, c)
            cols.append(s.reshape(n * ho * wo, c))
    p = jnp.concatenate(cols, axis=-1)                          # (M, 9*c), tap-major
    k_pad = _round_up(9 * c, LANE)
    p = jnp.pad(p, ((0, 0), (0, k_pad - 9 * c)))                # pad K ONCE, not per tap
    return p.astype(jnp.bfloat16), ho, wo


# ---------------------------------------------------------------------------
# Synthetic encoder parameters
# ---------------------------------------------------------------------------
def init_logical_params(key, in_channels=3):
    """Synthetic encoder weights, tap-major layout w9[tap = 3*kh + kw, c_in, c_out]."""
    params = []
    c_in = in_channels
    for i, c_out in enumerate(ENCODER_CHANNELS):
        kw, kb = jax.random.split(jax.random.fold_in(key, i))
        w9 = jax.random.normal(kw, (9, c_in, c_out), jnp.float32) / jnp.sqrt(9.0 * c_in)
        b = jax.random.normal(kb, (c_out,), jnp.float32) * 0.01
        # NOTE: if real PyTorch Conv2d weights (C_out, C_in, kH, kW) are ever loaded,
        # transpose to tap-major (3*kH + kW, C_in, C_out) before pack_params.
        params.append((w9, b))
        c_in = c_out
    return params


def pack_params(logical_params):
    """(9, Cin, Cout) f32 -> tap-packed lane-dense ((Kpad, Coutpad) bf16, (1, Coutpad) f32)."""
    packed = []
    for w9, b in logical_params:
        _, c_in, c_out = w9.shape
        k_real = 9 * c_in
        k_pad = _round_up(k_real, LANE)
        cout_pad = _round_up(c_out, LANE)
        w = jnp.zeros((k_pad, cout_pad), jnp.float32)
        w = w.at[:k_real, :c_out].set(w9.reshape(k_real, c_out))
        bp = jnp.zeros((1, cout_pad), jnp.float32).at[0, :c_out].set(b)
        packed.append((w.astype(jnp.bfloat16), bp))
    return packed


# ---------------------------------------------------------------------------
# Forward: encoder(image)[-1] -> avgpool((1,1)) -> flatten
# ---------------------------------------------------------------------------
@jax.jit
def image_model_forward(image_nchw, packed_params):
    x = jnp.transpose(image_nchw, (0, 2, 3, 1)).astype(jnp.bfloat16)   # NHWC, bf16
    n = x.shape[0]
    n_layers = len(packed_params)
    y = None
    for i, (w, b) in enumerate(packed_params):
        last = i == n_layers - 1
        patches, ho, wo = _build_patches(x)
        y = packed_conv(patches, w, b, n_img=n, fuse_gap=last)   # last: GAP fused in-kernel
        if not last:
            # back to NHWC, dropping zero lane padding, for the next layer's im2col
            x = y.reshape(n, ho, wo, -1)[..., :ENCODER_CHANNELS[i]]
    return y[:, :OUTPUT_DIM]   # (N, 32) f32; drop zero lane padding


# ---------------------------------------------------------------------------
# Pure-JAX reference (same bf16 rounding points) for a correctness check
# ---------------------------------------------------------------------------
def reference_forward(image_nchw, logical_params):
    x = jnp.transpose(image_nchw, (0, 2, 3, 1)).astype(jnp.bfloat16)
    n_layers = len(logical_params)
    feat = None
    for i, (w9, b) in enumerate(logical_params):
        c_in, c_out = w9.shape[1], w9.shape[2]
        k_hwio = w9.astype(jnp.bfloat16).astype(jnp.float32).reshape(3, 3, c_in, c_out)
        y = lax.conv_general_dilated(
            x.astype(jnp.float32), k_hwio, window_strides=(2, 2),
            padding=((1, 1), (1, 1)), dimension_numbers=("NHWC", "HWIO", "NHWC"))
        y = jnp.maximum(y + b.reshape(1, 1, 1, -1), 0.0)
        if i < n_layers - 1:
            x = y.astype(jnp.bfloat16)
        else:
            feat = y
    return jnp.mean(feat, axis=(1, 2))   # (N, OUTPUT_DIM)


# ---------------------------------------------------------------------------
if __name__ == "__main__":
    key = jax.random.PRNGKey(0)
    k_img, k_par = jax.random.split(key)

    # small shapes: batch=2, channels=3 (RGB), spatial=16x16
    image = jax.random.normal(k_img, (2, 3, 16, 16), jnp.float32)

    logical = init_logical_params(k_par, in_channels=3)
    packed = pack_params(logical)

    out = image_model_forward(image, packed)
    out = jax.block_until_ready(out)

    assert out.shape == (2, OUTPUT_DIM), out.shape
    assert out.dtype == jnp.float32
    assert bool(jnp.all(jnp.isfinite(out)))

    ref = reference_forward(image, logical)
    assert bool(jnp.allclose(out, ref, atol=2e-2, rtol=2e-2)), (out, ref)

    print("KERNEL_OK")
</pallas_src>

<mosaic_0001>
module attributes {stable_mosaic.version = 11 : i64} {
  func.func @_packed_conv_kernel(%arg0: i32, %arg1: memref<128x128xbf16, #tpu.memory_space<vmem>>, %arg2: memref<128x128xbf16, #tpu.memory_space<vmem>>, %arg3: memref<1x128xf32, #tpu.memory_space<vmem>>, %arg4: memref<128x128xbf16, #tpu.memory_space<vmem>>) attributes {dimension_semantics = [#tpu.dimension_semantics<parallel>], iteration_bounds = array<i64: 1>, scalar_prefetch = 0 : i64, scratch_operands = 0 : i64, tpu.core_type = #tpu.core_type<tc>, window_params = [{pipeline_mode = #tpu.pipeline_mode<synchronous>, transform_indices = @transform_0, window_bounds = array<i64: 128, 128>}, {transform_indices = @transform_1, window_bounds = array<i64: 128, 128>}, {transform_indices = @transform_2, window_bounds = array<i64: 1, 128>}, {transform_indices = @transform_3, window_bounds = array<i64: 128, 128>}]} {
    %c0 = arith.constant 0 : index
    %c0_0 = arith.constant 0 : index
    %0 = vector.load %arg1[%c0, %c0_0] : memref<128x128xbf16, #tpu.memory_space<vmem>>, vector<128x128xbf16>
    %c0_1 = arith.constant 0 : index
    %c0_2 = arith.constant 0 : index
    %1 = vector.load %arg2[%c0_1, %c0_2] : memref<128x128xbf16, #tpu.memory_space<vmem>>, vector<128x128xbf16>
    %cst = arith.constant dense<0.000000e+00> : vector<128x128xf32>
    %2 = tpu.matmul %0, %1, %cst {dimension_numbers = #tpu.dot_dimension_numbers<[1], [0], [0], [1], [0, 0, 1, 1], [], []>} : vector<128x128xbf16>, vector<128x128xbf16>, vector<128x128xf32> -> vector<128x128xf32>
    %c0_3 = arith.constant 0 : index
    %c0_4 = arith.constant 0 : index
    %3 = vector.load %arg3[%c0_3, %c0_4] : memref<1x128xf32, #tpu.memory_space<vmem>>, vector<1x128xf32>
    %4 = vector.broadcast %3 : vector<1x128xf32> to vector<128x128xf32>
    %5 = arith.addf %2, %4 : vector<128x128xf32>
    %cst_5 = arith.constant 0.000000e+00 : f32
    %6 = vector.broadcast %cst_5 : f32 to vector<128x128xf32>
    %7 = arith.maximumf %5, %6 : vector<128x128xf32>
    %8 = arith.truncf %7 : vector<128x128xf32> to vector<128x128xbf16>
    %c0_6 = arith.constant 0 : index
    %c0_7 = arith.constant 0 : index
    %9 = vector.load %arg4[%c0_6, %c0_7] : memref<128x128xbf16, #tpu.memory_space<vmem>>, vector<128x128xbf16>
    tpu.vector_store %arg4[%c0_6, %c0_7], %8 {strides = array<i32>} : memref<128x128xbf16, #tpu.memory_space<vmem>>, vector<128x128xbf16>,
    return
  }
  func.func @transform_0(%arg0: i32) -> (i32, i32) {
    %c0_i32 = arith.constant 0 : i32
    %c0_i32_0 = arith.constant 0 : i32
    %c0_i32_1 = arith.constant 0 : i32
    return %c0_i32, %c0_i32_0 : i32, i32
  }
  func.func @transform_1(%arg0: i32) -> (i32, i32) {
    %c0_i32 = arith.constant 0 : i32
    %c0_i32_0 = arith.constant 0 : i32
    return %c0_i32, %arg0 : i32, i32
  }
  func.func @transform_2(%arg0: i32) -> (i32, i32) {
    %c0_i32 = arith.constant 0 : i32
    %c0_i32_0 = arith.constant 0 : i32
    return %c0_i32, %arg0 : i32, i32
  }
  func.func @transform_3(%arg0: i32) -> (i32, i32) {
    %c0_i32 = arith.constant 0 : i32
    %c0_i32_0 = arith.constant 0 : i32
    return %c0_i32, %arg0 : i32, i32
  }
}

module attributes {stable_mosaic.version = 11 : i64} {
  func.func @_packed_conv_kernel(%arg0: i32, %arg1: memref<32x128xbf16, #tpu.memory_space<vmem>>, %arg2: memref<128x128xbf16, #tpu.memory_space<vmem>>, %arg3: memref<1x128xf32, #tpu.memory_space<vmem>>, %arg4: memref<32x128xbf16, #tpu.memory_space<vmem>>) attributes {dimension_semantics = [#tpu.dimension_semantics<parallel>], iteration_bounds = array<i64: 1>, scalar_prefetch = 0 : i64, scratch_operands = 0 : i64, tpu.core_type = #tpu.core_type<tc>, window_params = [{pipeline_mode = #tpu.pipeline_mode<synchronous>, transform_indices = @transform_0, window_bounds = array<i64: 32, 128>}, {transform_indices = @transform_1, window_bounds = array<i64: 128, 128>}, {transform_indices = @transform_2, window_bounds = array<i64: 1, 128>}, {transform_indices = @transform_3, window_bounds = array<i64: 32, 128>}]} {
    %c0 = arith.constant 0 : index
    %c0_0 = arith.constant 0 : index
    %0 = vector.load %arg1[%c0, %c0_0] : memref<32x128xbf16, #tpu.memory_space<vmem>>, vector<32x128xbf16>
    %c0_1 = arith.constant 0 : index
    %c0_2 = arith.constant 0 : index
    %1 = vector.load %arg2[%c0_1, %c0_2] : memref<128x128xbf16, #tpu.memory_space<vmem>>, vector<128x128xbf16>
    %cst = arith.constant dense<0.000000e+00> : vector<32x128xf32>
    %2 = tpu.matmul %0, %1, %cst {dimension_numbers = #tpu.dot_dimension_numbers<[1], [0], [0], [1], [0, 0, 1, 1], [], []>} : vector<32x128xbf16>, vector<128x128xbf16>, vector<32x128xf32> -> vector<32x128xf32>
    %c0_3 = arith.constant 0 : index
    %c0_4 = arith.constant 0 : index
    %3 = vector.load %arg3[%c0_3, %c0_4] : memref<1x128xf32, #tpu.memory_space<vmem>>, vector<1x128xf32>
    %4 = vector.broadcast %3 : vector<1x128xf32> to vector<32x128xf32>
    %5 = arith.addf %2, %4 : vector<32x128xf32>
    %cst_5 = arith.constant 0.000000e+00 : f32
    %6 = vector.broadcast %cst_5 : f32 to vector<32x128xf32>
    %7 = arith.maximumf %5, %6 : vector<32x128xf32>
    %8 = arith.truncf %7 : vector<32x128xf32> to vector<32x128xbf16>
    %c0_6 = arith.constant 0 : index
    %c0_7 = arith.constant 0 : index
    %9 = vector.load %arg4[%c0_6, %c0_7] : memref<32x128xbf16, #tpu.memory_space<vmem>>, vector<32x128xbf16>
    tpu.vector_store %arg4[%c0_6, %c0_7], %8 {strides = array<i32>} : memref<32x128xbf16, #tpu.memory_space<vmem>>, vector<32x128xbf16>,
    return
  }
  func.func @transform_0(%arg0: i32) -> (i32, i32) {
    %c0_i32 = arith.constant 0 : i32
    %c0_i32_0 = arith.constant 0 : i32
    %c0_i32_1 = arith.constant 0 : i32
    return %c0_i32, %c0_i32_0 : i32, i32
  }
  func.func @transform_1(%arg0: i32) -> (i32, i32) {
    %c0_i32 = arith.constant 0 : i32
    %c0_i32_0 = arith.constant 0 : i32
    return %c0_i32, %arg0 : i32, i32
  }
  func.func @transform_2(%arg0: i32) -> (i32, i32) {
    %c0_i32 = arith.constant 0 : i32
    %c0_i32_0 = arith.constant 0 : i32
    return %c0_i32, %arg0 : i32, i32
  }
  func.func @transform_3(%arg0: i32) -> (i32, i32) {
    %c0_i32 = arith.constant 0 : i32
    %c0_i32_0 = arith.constant 0 : i32
    return %c0_i32, %arg0 : i32, i32
  }
}

module attributes {stable_mosaic.version = 11 : i64} {
  func.func @_packed_conv_kernel(%arg0: i32, %arg1: memref<8x256xbf16, #tpu.memory_space<vmem>>, %arg2: memref<256x128xbf16, #tpu.memory_space<vmem>>, %arg3: memref<1x128xf32, #tpu.memory_space<vmem>>, %arg4: memref<2x128xf32, #tpu.memory_space<vmem>>) attributes {dimension_semantics = [#tpu.dimension_semantics<parallel>], iteration_bounds = array<i64: 1>, scalar_prefetch = 0 : i64, scratch_operands = 0 : i64, tpu.core_type = #tpu.core_type<tc>, window_params = [{pipeline_mode = #tpu.pipeline_mode<synchronous>, transform_indices = @transform_0, window_bounds = array<i64: 8, 256>}, {transform_indices = @transform_1, window_bounds = array<i64: 256, 128>}, {transform_indices = @transform_2, window_bounds = array<i64: 1, 128>}, {transform_indices = @transform_3, window_bounds = array<i64: 2, 128>}]} {
    %c0 = arith.constant 0 : index
    %c0_0 = arith.constant 0 : index
    %0 = vector.load %arg1[%c0, %c0_0] : memref<8x256xbf16, #tpu.memory_space<vmem>>, vector<8x256xbf16>
    %c0_1 = arith.constant 0 : index
    %c0_2 = arith.constant 0 : index
    %1 = vector.load %arg2[%c0_1, %c0_2] : memref<256x128xbf16, #tpu.memory_space<vmem>>, vector<256x128xbf16>
    %cst = arith.constant dense<0.000000e+00> : vector<8x128xf32>
    %2 = tpu.matmul %0, %1, %cst {dimension_numbers = #tpu.dot_dimension_numbers<[1], [0], [0], [1], [0, 0, 1, 1], [], []>} : vector<8x256xbf16>, vector<256x128xbf16>, vector<8x128xf32> -> vector<8x128xf32>
    %c0_3 = arith.constant 0 : index
    %c0_4 = arith.constant 0 : index
    %3 = vector.load %arg3[%c0_3, %c0_4] : memref<1x128xf32, #tpu.memory_space<vmem>>, vector<1x128xf32>
    %4 = vector.broadcast %3 : vector<1x128xf32> to vector<8x128xf32>
    %5 = arith.addf %2, %4 : vector<8x128xf32>
    %cst_5 = arith.constant 0.000000e+00 : f32
    %6 = vector.broadcast %cst_5 : f32 to vector<8x128xf32>
    %7 = arith.maximumf %5, %6 : vector<8x128xf32>
    %8 = tpu.iota {dimensions = array<i32: 0>} : vector<2x8xi32>
    %9 = tpu.iota {dimensions = array<i32: 1>} : vector<2x8xi32>
    %c4_i32 = arith.constant 4 : i32
    %10 = vector.broadcast %c4_i32 : i32 to vector<2x8xi32>
    %11 = arith.muli %8, %10 : vector<2x8xi32>
    %12 = arith.cmpi sge, %9, %11 : vector<2x8xi32>
    %c4_i32_6 = arith.constant 4 : i32
    %13 = vector.broadcast %c4_i32_6 : i32 to vector<2x8xi32>
    %14 = arith.addi %11, %13 : vector<2x8xi32>
    %15 = arith.cmpi slt, %9, %14 : vector<2x8xi32>
    %16 = arith.andi %12, %15 : vector<2x8xi1>
    %cst_7 = arith.constant 2.500000e-01 : f32
    %cst_8 = arith.constant 0.000000e+00 : f32
    %17 = vector.broadcast %cst_7 : f32 to vector<2x8xf32>
    %18 = vector.broadcast %cst_8 : f32 to vector<2x8xf32>
    %19 = arith.select %16, %17, %18 : vector<2x8xi1>, vector<2x8xf32>
    %cst_9 = arith.constant dense<0.000000e+00> : vector<2x128xf32>
    %20 = tpu.matmul %19, %7, %cst_9 {dimension_numbers = #tpu.dot_dimension_numbers<[1], [0], [0], [1], [0, 0, 1, 1], [], []>} : vector<2x8xf32>, vector<8x128xf32>, vector<2x128xf32> -> vector<2x128xf32>
    %c0_10 = arith.constant 0 : index
    %c0_11 = arith.constant 0 : index
    %21 = vector.load %arg4[%c0_10, %c0_11] : memref<2x128xf32, #tpu.memory_space<vmem>>, vector<2x128xf32>
    tpu.vector_store %arg4[%c0_10, %c0_11], %20 {strides = array<i32>} : memref<2x128xf32, #tpu.memory_space<vmem>>, vector<2x128xf32>,
    return
  }
  func.func @transform_0(%arg0: i32) -> (i32, i32) {
    %c0_i32 = arith.constant 0 : i32
    %c0_i32_0 = arith.constant 0 : i32
    %c0_i32_1 = arith.constant 0 : i32
    return %c0_i32, %c0_i32_0 : i32, i32
  }
  func.func @transform_1(%arg0: i32) -> (i32, i32) {
    %c0_i32 = arith.constant 0 : i32
    %c0_i32_0 = arith.constant 0 : i32
    return %c0_i32, %arg0 : i32, i32
  }
  func.func @transform_2(%arg0: i32) -> (i32, i32) {
    %c0_i32 = arith.constant 0 : i32
    %c0_i32_0 = arith.constant 0 : i32
    return %c0_i32, %arg0 : i32, i32
  }
  func.func @transform_3(%arg0: i32) -> (i32, i32) {
    %c0_i32 = arith.constant 0 : i32
    %c0_i32_0 = arith.constant 0 : i32
    return %c0_i32, %arg0 : i32, i32
  }
}

</mosaic_0001>

<bundles_post_ra>
// kernel: image_model_forward.4
= control target key start
LH: loop header
LB: loop body
LE: loop exit
PB: predicated region body
PF: predicated region fallthrough
CT: control target
= control target key end

     0   :  { %s308_s1 = inlined_call_operand.vmem [shape: bf16[128,128], index: 1, kind: input, shape index: {}]   ;;  %s309_s0 = inlined_call_operand.vmem [shape: bf16[32,128], index: 0, kind: input, shape index: {}]   ;;  %s310_s2 = inlined_call_operand.vmem [shape: f32[1,128], index: 2, kind: input, shape index: {}]   ;;  %s311_s3 = inlined_call_operand.vmem [shape: bf16[32,128], index: 3, kind: output, shape index: {}]  }
   0x1   :  { %v239_v0 = vld [vmem:[%s308_s1] sm:$0xff]   ;;  %v240_v1 = vld [vmem:[%s308_s1 + $0x8] sm:$0xff]   ;;  %v241_v2 = vld [vmem:[%s308_s1 + $0x10] sm:$0xff]  }
   0x2   :  { %219 = vmatprep.subr.bf16.mxu0 %v239_v0  ;;  %v242_v3 = vld [vmem:[%s308_s1 + $0x18] sm:$0xff]   ;;  %v247_v4 = vld [vmem:[%s309_s0] sm:$0xff]   ;;  %v244_v6 = vld [vmem:[%s308_s1 + $0x28] sm:$0xff]  }
   0x3   :  { %220 = vmatpush3.bf16.msra.mxu0 %v239_v0  ;;  %235 = vmatprep.mubr.bf16.mxu0 %v247_v4  ;;  %v243_v5 = vld [vmem:[%s308_s1 + $0x20] sm:$0xff]   ;;  %v245_v7 = vld [vmem:[%s308_s1 + $0x30] sm:$0xff]   ;;  %v246_v8 = vld [vmem:[%s308_s1 + $0x38] sm:$0xff]  }
   0x4   :  { %221 = vmatprep.subr.bf16.mxu0 %v240_v1  ;;  %v248_v9 = vld [vmem:[%s309_s0 + $0x8] sm:$0xff]   ;;  %v179_v10 = vld [vmem:[%s310_s2] ss:$0 sm:$0xff] }
   0x7   :  { %222 = vmatpush3.bf16.msra.mxu0 %v240_v1 }
   0x8   :  { %223 = vmatprep.subr.bf16.mxu0 %v241_v2 }
   0xb   :  { %224 = vmatpush3.bf16.msra.mxu0 %v241_v2 }
   0xc   :  { %225 = vmatprep.subr.bf16.mxu0 %v242_v3 }
   0xf   :  { %226 = vmatpush3.bf16.msra.mxu0 %v242_v3 }
  0x10   :  { %227 = vmatprep.subr.bf16.mxu0 %v243_v5 }
  0x13   :  { %228 = vmatpush3.bf16.msra.mxu0 %v243_v5 }
  0x14   :  { %229 = vmatprep.subr.bf16.mxu0 %v244_v6 }
  0x17   :  { %230 = vmatpush3.bf16.msra.mxu0 %v244_v6 }
  0x18   :  { %231 = vmatprep.subr.bf16.mxu0 %v245_v7 }
  0x1b   :  { %232 = vmatpush3.bf16.msra.mxu0 %v245_v7 }
  0x1c   :  { %233 = vmatprep.subr.bf16.mxu0 %v246_v8 }
  0x1f   :  { %234 = vmatpush3.bf16.msra.mxu0 %v246_v8 }
  0x22   :  { %236 = vmatmul.mubr.bf16.vlgmr.msra.gmra.mrb[0].mxu0 %v248_v9 }
  0xf5   :  { %v237_v11 = vpop.f32.mrb[0].mxu0 }
  0xf6   :  { %v145_v12 = vadd.f32 %v237_v11, %v179_v10  ;;  %v136_v13 = vpop.f32.mrb[1].mxu0 }
  0xf7   :  { %v137_v14 = vadd.f32 %v179_v10, %v136_v13  ;;  %v238_v15 = vpop.f32.mrb[2].mxu0 }
  0xf8   :  { %v148_v16 = vadd.f32 %v238_v15, %v179_v10  ;;  %v139_v17 = vpop.f32.mrb[3].mxu0  ;;  %v153_v19 = vmax.f32 %v145_v12, 0.0 }
  0xf9   :  { %v140_v18 = vadd.f32 %v179_v10, %v139_v17  ;;  %v151_v21 = vmax.f32 %v137_v14, 0.0 }
  0xfa   :  { %v154_v20 = vmax.f32 %v148_v16, 0.0 }
  0xfb   :  { %v152_v22 = vmax.f32 %v140_v18, 0.0 }
  0xfc   :  { %v206_v23 = vpack.c.bf16 %v154_v20, %v153_v19 }
  0xfd   :  { %v201_v24 = vpack.c.bf16 %v152_v22, %v151_v21 }
  0xfe   :  { %208 = vst [vmem:[%s311_s3 + $0x8] sm:$0xff] %v206_v23  }
  0xff   :  { %202 = vst [vmem:[%s311_s3] sm:$0xff] %v201_v24  }

// kernel: image_model_forward.3
= control target key start
LH: loop header
LB: loop body
LE: loop exit
PB: predicated region body
PF: predicated region fallthrough
CT: control target
= control target key end

     0   :  { %s618_s1 = inlined_call_operand.vmem [shape: bf16[128,128], index: 1, kind: input, shape index: {}]   ;;  %s619_s0 = inlined_call_operand.vmem [shape: bf16[128,128], index: 0, kind: input, shape index: {}]   ;;  %s620_s2 = inlined_call_operand.vmem [shape: f32[1,128], index: 2, kind: input, shape index: {}]   ;;  %s621_s3 = inlined_call_operand.vmem [shape: bf16[128,128], index: 3, kind: output, shape index: {}]  }
   0x1   :  { %v507_v0 = vld [vmem:[%s618_s1] sm:$0xff]   ;;  %v508_v1 = vld [vmem:[%s618_s1 + $0x8] sm:$0xff]   ;;  %v509_v2 = vld [vmem:[%s618_s1 + $0x10] sm:$0xff]  }
   0x2   :  { %459 = vmatprep.subr.bf16.mxu0 %v507_v0  ;;  %491 = vmatprep.subr.bf16.mxu1 %v507_v0  ;;  %v510_v3 = vld [vmem:[%s618_s1 + $0x18] sm:$0xff]   ;;  %v515_v4 = vld [vmem:[%s619_s0] sm:$0xff]   ;;  %v512_v7 = vld [vmem:[%s618_s1 + $0x28] sm:$0xff]  }
   0x3   :  { %460 = vmatpush3.bf16.msra.mxu0 %v507_v0  ;;  %499 = vmatpush3.bf16.msra.mxu1 %v507_v0  ;;  %v516_v5 = vld [vmem:[%s619_s0 + $0x20] sm:$0xff]   ;;  %v513_v8 = vld [vmem:[%s618_s1 + $0x30] sm:$0xff]   ;;  %v514_v9 = vld [vmem:[%s618_s1 + $0x38] sm:$0xff]  }
   0x4   :  { %461 = vmatprep.subr.bf16.mxu0 %v508_v1  ;;  %492 = vmatprep.subr.bf16.mxu1 %v508_v1  ;;  %v511_v6 = vld [vmem:[%s618_s1 + $0x20] sm:$0xff]   ;;  %v517_v10 = vld [vmem:[%s619_s0 + $0x8] sm:$0xff]   ;;  %v519_v12 = vld [vmem:[%s619_s0 + $0x10] sm:$0xff]  }
   0x5   :  { %475 = vmatprep.mubr.bf16.mxu0 %v515_v4  ;;  %483 = vmatprep.mubr.bf16.mxu1 %v516_v5  ;;  %v518_v11 = vld [vmem:[%s619_s0 + $0x28] sm:$0xff]   ;;  %v520_v13 = vld [vmem:[%s619_s0 + $0x30] sm:$0xff]   ;;  %v521_v14 = vld [vmem:[%s619_s0 + $0x18] sm:$0xff]  }
   0x6   :  { %v522_v15 = vld [vmem:[%s619_s0 + $0x38] sm:$0xff]   ;;  %v347_v16 = vld [vmem:[%s620_s2] ss:$0 sm:$0xff] }
   0x7   :  { %462 = vmatpush3.bf16.msra.mxu0 %v508_v1  ;;  %500 = vmatpush3.bf16.msra.mxu1 %v508_v1 }
   0x8   :  { %463 = vmatprep.subr.bf16.mxu0 %v509_v2  ;;  %493 = vmatprep.subr.bf16.mxu1 %v509_v2 }
   0xb   :  { %464 = vmatpush3.bf16.msra.mxu0 %v509_v2  ;;  %501 = vmatpush3.bf16.msra.mxu1 %v509_v2 }
   0xc   :  { %465 = vmatprep.subr.bf16.mxu0 %v510_v3  ;;  %494 = vmatprep.subr.bf16.mxu1 %v510_v3 }
   0xf   :  { %466 = vmatpush3.bf16.msra.mxu0 %v510_v3  ;;  %502 = vmatpush3.bf16.msra.mxu1 %v510_v3 }
  0x10   :  { %467 = vmatprep.subr.bf16.mxu0 %v511_v6  ;;  %495 = vmatprep.subr.bf16.mxu1 %v511_v6 }
  0x13   :  { %468 = vmatpush3.bf16.msra.mxu0 %v511_v6  ;;  %503 = vmatpush3.bf16.msra.mxu1 %v511_v6 }
  0x14   :  { %469 = vmatprep.subr.bf16.mxu0 %v512_v7  ;;  %496 = vmatprep.subr.bf16.mxu1 %v512_v7 }
  0x17   :  { %470 = vmatpush3.bf16.msra.mxu0 %v512_v7  ;;  %504 = vmatpush3.bf16.msra.mxu1 %v512_v7 }
  0x18   :  { %471 = vmatprep.subr.bf16.mxu0 %v513_v8  ;;  %497 = vmatprep.subr.bf16.mxu1 %v513_v8 }
  0x1b   :  { %472 = vmatpush3.bf16.msra.mxu0 %v513_v8  ;;  %505 = vmatpush3.bf16.msra.mxu1 %v513_v8 }
  0x1c   :  { %473 = vmatprep.subr.bf16.mxu0 %v514_v9  ;;  %498 = vmatprep.subr.bf16.mxu1 %v514_v9 }
  0x1f   :  { %474 = vmatpush3.bf16.msra.mxu0 %v514_v9  ;;  %506 = vmatpush3.bf16.msra.mxu1 %v514_v9 }
  0x22   :  { %476 = vmatmul.mubr.bf16.vlgmr.msra.gmra.mrb[0].mxu0 %v517_v10  ;;  %484 = vmatmul.mubr.bf16.vlgmr.msra.gmra.mrb[0].mxu1 %v518_v11 }
  0x23   :  { %479 = vmatprep.mubr.bf16.mxu0 %v519_v12  ;;  %487 = vmatprep.mubr.bf16.mxu1 %v520_v13 }
  0x2a   :  { %480 = vmatmul.mubr.bf16.gmra.mrb[4].mxu0 %v521_v14  ;;  %488 = vmatmul.mubr.bf16.gmra.mrb[4].mxu1 %v522_v15 }
  0xf5   :  { %v477_v17 = vpop.f32.mrb[0].mxu0  ;;  %v485_v18 = vpop.f32.mrb[0].mxu1 }
  0xf6   :  { %v193_v19 = vadd.f32 %v477_v17, %v347_v16  ;;  %v225_v20 = vadd.f32 %v485_v18, %v347_v16  ;;  %v184_v21 = vpop.f32.mrb[1].mxu0  ;;  %v216_v22 = vpop.f32.mrb[1].mxu1 }
  0xf7   :  { %v185_v23 = vadd.f32 %v347_v16, %v184_v21  ;;  %v217_v24 = vadd.f32 %v347_v16, %v216_v22  ;;  %v478_v25 = vpop.f32.mrb[2].mxu0  ;;  %v486_v26 = vpop.f32.mrb[2].mxu1 }
  0xf8   :  { %v196_v27 = vadd.f32 %v478_v25, %v347_v16  ;;  %v228_v28 = vadd.f32 %v486_v26, %v347_v16  ;;  %v187_v29 = vpop.f32.mrb[3].mxu0  ;;  %v219_v30 = vpop.f32.mrb[3].mxu1  ;;  %v249_v33 = vmax.f32 %v193_v19, 0.0  ;;  %v257_v34 = vmax.f32 %v225_v20, 0.0 }
  0xf9   :  { %v188_v31 = vadd.f32 %v347_v16, %v187_v29  ;;  %v220_v32 = vadd.f32 %v347_v16, %v219_v30  ;;  %v247_v37 = vmax.f32 %v185_v23, 0.0  ;;  %v255_v38 = vmax.f32 %v217_v24, 0.0 }
  0xfa   :  { %v250_v35 = vmax.f32 %v196_v27, 0.0  ;;  %v258_v36 = vmax.f32 %v228_v28, 0.0 }
  0xfb   :  { %v248_v39 = vmax.f32 %v188_v31, 0.0  ;;  %v256_v40 = vmax.f32 %v220_v32, 0.0 }
  0xfc   :  { %v404_v41 = vpack.c.bf16 %v250_v35, %v249_v33  ;;  %v424_v42 = vpack.c.bf16 %v258_v36, %v257_v34 }
  0xfd   :  { %v399_v43 = vpack.c.bf16 %v248_v39, %v247_v37  ;;  %v419_v44 = vpack.c.bf16 %v256_v40, %v255_v38  ;;  %v481_v45 = vpop.f32.mrb[4].mxu0  ;;  %v489_v46 = vpop.f32.mrb[4].mxu1 }
  0xfe   :  { %436 = vst [vmem:[%s621_s3 + $0x8] sm:$0xff] %v404_v41   ;;  %440 = vst [vmem:[%s621_s3 + $0x28] sm:$0xff] %v424_v42   ;;  %v209_v47 = vadd.f32 %v481_v45, %v347_v16  ;;  %v241_v48 = vadd.f32 %v489_v46, %v347_v16  ;;  %v200_v49 = vpop.f32.mrb[5].mxu0  ;;  %v232_v50 = vpop.f32.mrb[5].mxu1 }
  0xff   :  { %400 = vst [vmem:[%s621_s3] sm:$0xff] %v399_v43   ;;  %439 = vst [vmem:[%s621_s3 + $0x20] sm:$0xff] %v419_v44   ;;  %v201_v51 = vadd.f32 %v347_v16, %v200_v49  ;;  %v233_v52 = vadd.f32 %v347_v16, %v232_v50  ;;  %v482_v53 = vpop.f32.mrb[6].mxu0  ;;  %v490_v54 = vpop.f32.mrb[6].mxu1 }
 0x100   :  { %v212_v55 = vadd.f32 %v482_v53, %v347_v16  ;;  %v244_v56 = vadd.f32 %v490_v54, %v347_v16  ;;  %v203_v57 = vpop.f32.mrb[7].mxu0  ;;  %v235_v58 = vpop.f32.mrb[7].mxu1  ;;  %v253_v61 = vmax.f32 %v209_v47, 0.0  ;;  %v261_v62 = vmax.f32 %v241_v48, 0.0 }
 0x101   :  { %v204_v59 = vadd.f32 %v347_v16, %v203_v57  ;;  %v236_v60 = vadd.f32 %v347_v16, %v235_v58  ;;  %v251_v1 = vmax.f32 %v201_v51, 0.0  ;;  %v259_v2 = vmax.f32 %v233_v52, 0.0 }
 0x102   :  { %v254_v63 = vmax.f32 %v212_v55, 0.0  ;;  %v262_v0 = vmax.f32 %v244_v56, 0.0 }
 0x103   :  { %v252_v3 = vmax.f32 %v204_v59, 0.0  ;;  %v260_v4 = vmax.f32 %v236_v60, 0.0 }
 0x104   :  { %v414_v5 = vpack.c.bf16 %v254_v63, %v253_v61  ;;  %v434_v6 = vpack.c.bf16 %v262_v0, %v261_v62 }
 0x105   :  { %v409_v7 = vpack.c.bf16 %v252_v3, %v251_v1  ;;  %v429_v8 = vpack.c.bf16 %v260_v4, %v259_v2 }
 0x106   :  { %438 = vst [vmem:[%s621_s3 + $0x18] sm:$0xff] %v414_v5   ;;  %442 = vst [vmem:[%s621_s3 + $0x38] sm:$0xff] %v434_v6  }
 0x107   :  { %437 = vst [vmem:[%s621_s3 + $0x10] sm:$0xff] %v409_v7   ;;  %441 = vst [vmem:[%s621_s3 + $0x30] sm:$0xff] %v429_v8  }

// kernel: image_model_forward.5
= control target key start
LH: loop header
LB: loop body
LE: loop exit
PB: predicated region body
PF: predicated region fallthrough
CT: control target
= control target key end

     0   :  { %s482_s0 = inlined_call_operand.vmem [shape: bf16[8,256], index: 0, kind: input, shape index: {}]   ;;  %s483_s1 = inlined_call_operand.vmem [shape: bf16[256,128], index: 1, kind: input, shape index: {}]   ;;  %s484_s2 = inlined_call_operand.vmem [shape: f32[1,128], index: 2, kind: input, shape index: {}]   ;;  %s485_s3 = inlined_call_operand.hbm [shape: f32[2,128], index: 3, kind: output, shape index: {}]  }
   0x1   :  { %v351_v0 = vld [vmem:[%s483_s1 + $0x40] sm:$0xff]   ;;  %v353_v2 = vld [vmem:[%s483_s1 + $0x48] sm:$0xff]   ;;  %v355_v4 = vld [vmem:[%s483_s1 + $0x50] sm:$0xff]  }
   0x2   :  { %v352_v1 = vld [vmem:[%s483_s1] sm:$0xff]   ;;  %319 = vmatprep.subr.bf16.mxu0 %v351_v0  ;;  %v354_v3 = vld [vmem:[%s483_s1 + $0x8] sm:$0xff]   ;;  %v356_v5 = vld [vmem:[%s483_s1 + $0x10] sm:$0xff]  }
   0x3   :  { %320 = vmatpush3.bf16.msra.mxu0 %v352_v1  ;;  %v357_v6 = vld [vmem:[%s483_s1 + $0x58] sm:$0xff]   ;;  %v359_v8 = vld [vmem:[%s483_s1 + $0x60] sm:$0xff]   ;;  %v361_v10 = vld [vmem:[%s483_s1 + $0x68] sm:$0xff]  }
   0x4   :  { %321 = vmatprep.subr.bf16.mxu0 %v353_v2  ;;  %v358_v7 = vld [vmem:[%s483_s1 + $0x18] sm:$0xff]   ;;  %v360_v9 = vld [vmem:[%s483_s1 + $0x20] sm:$0xff]  }
   0x5   :  { %v16_v11 = vld [vmem:[%s482_s0] sm:$0xff] }
   0x7   :  { %322 = vmatpush3.bf16.msra.mxu0 %v354_v3 }
   0x8   :  { %323 = vmatprep.subr.bf16.mxu0 %v355_v4 }
   0xb   :  { %324 = vmatpush3.bf16.msra.mxu0 %v356_v5 }
   0xc   :  { %325 = vmatprep.subr.bf16.mxu0 %v357_v6 }
   0xf   :  { %326 = vmatpush3.bf16.msra.mxu0 %v358_v7 }
  0x10   :  { %327 = vmatprep.subr.bf16.mxu0 %v359_v8 }
  0x11   :  { %8 = vsyncpa [#allocation3], 0  ;;  %v301_v12 = vcombine.high %v16_v11, %v16_v11  ;;  %v362_v13 = vld [vmem:[%s483_s1 + $0x28] sm:$0xff]   ;;  %v363_v14 = vld [vmem:[%s483_s1 + $0x70] sm:$0xff]   ;;  %v300_v18 = vcombine.low %v16_v11, %v16_v11  ;;  %v393_v19 = vmov 0.0   ;;  %vm394_vm0 = vmmov 0  }
  0x12   :  { %v364_v15 = vld [vmem:[%s483_s1 + $0x30] sm:$0xff]   ;;  %v365_v16 = vld [vmem:[%s483_s1 + $0x78] sm:$0xff]   ;;  %343 = vmatprep.subr.mxu1 %v393_v19  ;;  %345 = vmatprep.mubr.msk.f32.mxu1 %vm394_vm0, %v393_v19  ;;  %v200_v20 = vlaneseq  ;;  %v299_v27 = vld [vmem:[%s484_s2] ss:$0 sm:$0xff]  ;;  %vm210_vm4 = vcmask 64512  }
  0x13   :  { %328 = vmatpush3.bf16.msra.mxu0 %v360_v9  ;;  %191 = vmatprep.mubr.bf16.mxu0 %v301_v12  ;;  %v366_v17 = vld [vmem:[%s483_s1 + $0x38] sm:$0xff]   ;;  %s395_s1 = smov [#allocation2]  }
  0x14   :  { %329 = vmatprep.subr.bf16.mxu0 %v361_v10  ;;  %v201_v21 = vshrl.u32 %v200_v20, 7  ;;  %v203_v23 = vand.u32 127, %v200_v20  ;;  %s291_s20 = sshll.u32 %s395_s1, 4  ;;  %s292_s20 = int_to_ptr.vmem [resolvable:$true] %s291_s20 }
  0x15   :  { %s369_s21 = scalar_lea.vmem %s292_s20, 32  ;;  %p374_p1 = scmp.lt.s32.totalorder %s292_s20, %s292_s20 }
  0x16   :  { %v204_v22 = vmul.u32 4, %v201_v21  ;;  %p370_p0 = scmp.ne.s32.totalorder %s292_s20, %s369_s21  ;;  %p375_p2 = scmp.lt.s32.totalorder %s369_s21, %s369_s21 }
  0x17   :  { %330 = vmatpush3.bf16.msra.mxu0 %v362_v13 }
  0x18   :  { %331 = vmatprep.subr.bf16.mxu0 %v363_v14  ;;  %v206_v24 = vadd.s32 4, %v204_v22  ;;  %vm205_vm1 = vcmp.ge.s32.totalorder %v203_v23, %v204_v22  ;;  %p376_p3 = por %p375_p2, %p374_p1 }
  0x1a   :  { %vm207_vm2 = vcmp.lt.s32.totalorder %v203_v23, %v206_v24  ;;  %p377_p4 = pnand %p376_p3, %p370_p0 }
  0x1b   :  { %332 = vmatpush3.bf16.msra.mxu0 %v364_v15  ;;  %vm208_vm3 = vmand %vm205_vm1, %vm207_vm2 }
  0x1c   :  { %333 = vmatprep.subr.bf16.mxu0 %v365_v16  ;;  %v209_v33 = vsel %vm208_vm3, 0.25, %v393_v19 }
  0x1f   :  { %334 = vmatpush3.bf16.msra.mxu0 %v366_v17 }
  0x22   :  { %192 = vmatmul.mubr.bf16.vlgmr.msra.gmra.mrb[0].mxu0 %v300_v18 }
  0xf5   :  { %v335_v25 = vpop.f32.mrb[0].mxu0 }
  0xf6   :  { %v336_v26 = vpop.f32.mrb[1].mxu0 }
  0xf7   :  { %v337_v28 = vadd.f32 %v336_v26, %v335_v25  ;;  %v338_v29 = vpop.f32.mrb[2].mxu0 }
  0xf8   :  { %v339_v30 = vpop.f32.mrb[3].mxu0 }
  0xf9   :  { %v194_v31 = vadd.f32 %v337_v28, %v299_v27 }
  0xfb   :  { %v199_v32 = vmax.f32 %v194_v31, 0.0 }
  0xfd   :  { %344 = vmatpush3.msra.mxu1 %v199_v32 }
  0xfe   :  { %346 = vmatmul.mubr.msk.f32.vlgmr.msra.gmra.mrb[0].mxu1 %vm210_vm4, %v209_v33 }
 0x1d1   :  { %v280_v34 = vpop.f32.mrb[0].mxu1 }
 0x1d2   :  { %284 = vst [vmem:[#allocation2] sm:$0x3] %v280_v34  ;;  %v347_v35 = vpop.f32.mrb[1].mxu1 }
 0x1d3   :  { %380 = shalt.err (!%p377_p4)
}
 0x1d4   :  { %s381_s23 = scalar_lea.hbm %s485_s3, 32 }
 0x1d5   :  { %p382_p5 = scmp.ne.s32.totalorder %s485_s3, %s381_s23  ;;  %p385_p6 = scmp.lt.u32.totalorder %s381_s23, %s485_s3 }
 0x1d7   :  { %p387_p7 = pnand %p385_p6, %p382_p5 }
 0x1d9   :  { %390 = shalt.err (!%p387_p7)
}
 0x1da   :  { %294 = dma.vmem_to_hbm [thread:$0]  %s292_s20, 32, %s485_s3, [#allocation3]  }
 0x1db   :  { %391 = dma.done.wait [#allocation3], 32  }
 0x1dc   :  { %392 = vsyncadd [#allocation3], 4294967264 }
 0x1dd   :  { %298 = vsyncpa [#allocation3], 1 }

</bundles_post_ra>
